<compile_context>
chip_gen: v7x
topology: tpu7x:2x2x1
jax: 0.10.0
libtpu: 0.0.40
codegen_flags: <defaults>
</compile_context>

<pallas_src>
import functools

import jax
import jax.numpy as jnp
import numpy as np
from jax.experimental import pallas as pl
from jax.experimental.pallas import tpu as pltpu


def _round_up(x, m):
    return ((x + m - 1) // m) * m


def _bessel_basis_kernel(d_ref, freq_ref, out_ref, *, inv_cutoff, cutoff,
                         norm_const, p, a, b, c, n_total, block_n):
    """d_ref: (1, TN) lane-dense distances; freq_ref: (R_pad, 1);
    out_ref: (R_pad, TN)."""
    # Global lane index for this block; lanes >= n_total are padding of a
    # ragged last block (their DMA write-back is masked by Pallas anyway).
    col = (jax.lax.broadcasted_iota(jnp.int32, d_ref.shape, 1)
           + pl.program_id(0) * block_n)
    in_range = col < n_total

    # Out-of-range lanes take d == cutoff so d_scaled == 1.0 exactly, the
    # strict `< 1` envelope test yields env == 0, and no divide-by-zero /
    # NaN can appear from whatever garbage sits in the padded input lanes.
    d = jnp.where(in_range, d_ref[...], cutoff)        # (1, TN)
    freq = freq_ref[...]                               # (R_pad, 1)

    d_scaled = d * inv_cutoff                          # (1, TN)

    # Envelope(p): 1/x + a*x^(p-1) + b*x^p + c*x^(p+1), zeroed where x >= 1.
    # True divides (not approx EUP reciprocal) keep the rtol=1e-5 agreement
    # with the reference even for very small d.
    inv_x = 1.0 / d_scaled
    x_pm1 = d_scaled ** (p - 1)                        # p is a static int
    x_p = x_pm1 * d_scaled
    x_pp1 = x_p * d_scaled
    env_val = inv_x + a * x_pm1 + b * x_p + c * x_pp1
    env = jnp.where(d_scaled < 1.0, env_val, 0.0)      # (1, TN)

    # All per-edge work folded once at (1, TN) width.
    row_scale = env * norm_const / d                   # (1, TN)

    # Only this broadcast multiply + sin run at full (R_pad, TN) width.
    # TODO(synk): jnp.sin (VPU range-reduction + polynomial) is the
    # saturating slot once layout/tiling are fixed; a custom bounded-range
    # minimax sin could cut it further but risks the 1e-5 check near sin()
    # zeros where row_scale is large (small d).
    out_ref[...] = row_scale * jnp.sin(freq * d_scaled)


def _default_dimension_semantics(num_blocks):
    """CORE_PARALLEL on v7x (2 TCs/chip) when there is enough work to split;
    plain 'parallel' elsewhere (near-zero-impact vs 'arbitrary' but safe)."""
    try:
        kind = jax.devices()[0].device_kind.lower()
    except Exception:  # pragma: no cover - defensive, never expected on TPU
        kind = ""
    if "v7" in kind and num_blocks >= 2:
        return (pltpu.CORE_PARALLEL,)
    return ("parallel",)


def bessel_basis_layer(d, frequencies, *, cutoff, envelope_exponent=5,
                       max_block_n=32768, transpose_output=True,
                       dimension_semantics=None):
    """JAX/Pallas equivalent of BesselBasisLayer.forward.

    Args:
      d: (N,) float32 distances.
      frequencies: (num_radial,) float32 learnable frequencies.
      cutoff: float cutoff distance.
      envelope_exponent: int exponent of the envelope function.
      max_block_n: max lane-axis tile size. 32768 lanes -> ~1 MiB per output
        buffer (x2 double buffering) at R_pad=8; comfortably inside the
        scoped VMEM limit on v5e/v6e/v7x.
      transpose_output: if True (default) return the PyTorch (N, num_radial)
        layout (adds one XLA transpose). Pass False to get the radial-major
        (num_radial, N) slab directly and fuse the transpose into the
        consumer instead (saves ~2/3 of end-to-end HBM traffic).
      dimension_semantics: override for CompilerParams; None -> auto.

    Returns:
      (N, num_radial) float32 if transpose_output else (num_radial, N).
    """
    n = int(d.shape[0])
    num_radial = int(frequencies.shape[0])

    inv_cutoff = 1.0 / float(cutoff)
    norm_const = (2.0 * inv_cutoff) ** 0.5

    # Envelope polynomial coefficients (same as GemNet's Envelope module).
    p = int(envelope_exponent) + 1
    a = -(p + 1) * (p + 2) / 2.0
    b = p * (p + 2.0)
    c = -p * (p + 1) / 2.0

    lane, sublane = 128, 8

    # Large blocks amortize per-step overhead and lengthen DMA bursts; keep
    # at least 2 grid steps when there is enough work (pipelining / v7x
    # core split), down to a single 128-lane block for tiny N.
    block_n = min(int(max_block_n),
                  max(lane, _round_up(-(-n // 2), lane)))
    num_blocks = pl.cdiv(n, block_n)

    # Pad the radial axis to a full sublane so (R_pad, TN) vregs and stores
    # are fully utilized; padded rows (freq == 0) are sliced off below.
    r_pad = max(sublane, _round_up(num_radial, sublane))
    freq_col = jnp.zeros((r_pad, 1), jnp.float32).at[:num_radial, 0].set(
        frequencies.astype(jnp.float32))

    d_row = d.astype(jnp.float32).reshape(1, n)

    kernel = functools.partial(
        _bessel_basis_kernel,
        inv_cutoff=float(inv_cutoff),
        cutoff=float(cutoff),
        norm_const=float(norm_const),
        p=p,
        a=float(a),
        b=float(b),
        c=float(c),
        n_total=n,
        block_n=block_n,
    )

    if dimension_semantics is None:
        dimension_semantics = _default_dimension_semantics(num_blocks)

    cost = pl.CostEstimate(
        flops=int(5 * r_pad * n),
        transcendentals=int(r_pad * n),
        bytes_accessed=int(4 * (n + r_pad * n)),
    )

    out_rn = pl.pallas_call(
        kernel,
        out_shape=jax.ShapeDtypeStruct((r_pad, n), jnp.float32),
        grid=(num_blocks,),
        in_specs=[
            pl.BlockSpec((1, block_n), lambda i: (0, i)),
            pl.BlockSpec((r_pad, 1), lambda i: (0, 0)),
        ],
        out_specs=pl.BlockSpec((r_pad, block_n), lambda i: (0, i)),
        compiler_params=pltpu.CompilerParams(
            dimension_semantics=dimension_semantics),
        cost_estimate=cost,
    )(d_row, freq_col)

    out_rn = out_rn[:num_radial]
    if transpose_output:
        # PyTorch layout (N, num_radial). Prefer transpose_output=False and a
        # fused consumer when embedding in the full GemNet graph.
        return out_rn.T
    return out_rn


def bessel_basis_ref(d, frequencies, *, cutoff, envelope_exponent=5):
    """Pure-JAX reference (mirrors the PyTorch forward)."""
    inv_cutoff = 1.0 / cutoff
    norm_const = (2.0 * inv_cutoff) ** 0.5
    p = envelope_exponent + 1
    a = -(p + 1) * (p + 2) / 2.0
    b = p * (p + 2.0)
    c = -p * (p + 1) / 2.0

    d = d[:, None]
    x = d * inv_cutoff
    env_val = 1.0 / x + a * x ** (p - 1) + b * x ** p + c * x ** (p + 1)
    env = jnp.where(x < 1.0, env_val, jnp.zeros_like(x))
    return env * norm_const * jnp.sin(frequencies[None, :] * x) / d


if __name__ == "__main__":
    cutoff = 5.0
    envelope_exponent = 5
    key = jax.random.PRNGKey(0)
    k1, k2 = jax.random.split(key)

    def run_case(num_radial, n_edges, subkey):
        # frequencies initialized exactly as in the PyTorch __init__:
        # pi * [1, 2, ..., num_radial]
        frequencies = jnp.asarray(
            np.pi * np.arange(1, num_radial + 1, dtype=np.float32))
        # Distances in (0, 2*cutoff) so both envelope branches are exercised.
        d = jax.random.uniform(subkey, (n_edges,), dtype=jnp.float32,
                               minval=0.1, maxval=2.0 * cutoff)
        out = bessel_basis_layer(d, frequencies, cutoff=cutoff,
                                 envelope_exponent=envelope_exponent)
        out = jax.block_until_ready(out)
        ref = bessel_basis_ref(d, frequencies, cutoff=cutoff,
                               envelope_exponent=envelope_exponent)
        np.testing.assert_allclose(np.asarray(out), np.asarray(ref),
                                   rtol=1e-5, atol=1e-5)

    # Default GemNet config.
    run_case(num_radial=8, n_edges=64, subkey=k1)
    # Ragged N (not a multiple of 128) and R not a multiple of 8: exercises
    # the in-kernel lane mask and the radial padding path.
    run_case(num_radial=6, n_edges=200, subkey=k2)

    print("KERNEL_OK")
</pallas_src>

<mosaic_0001>
module attributes {stable_mosaic.version = 11 : i64} {
  func.func @_bessel_basis_kernel(%arg0: i32, %arg1: memref<1x128xf32, #tpu.memory_space<vmem>>, %arg2: memref<8x1xf32, #tpu.memory_space<vmem>>, %arg3: memref<8x128xf32, #tpu.memory_space<vmem>>) attributes {dimension_semantics = [#tpu.dimension_semantics<parallel>], iteration_bounds = array<i64: 1>, scalar_prefetch = 0 : i64, scratch_operands = 0 : i64, tpu.core_type = #tpu.core_type<tc>, window_params = [{transform_indices = @transform_0, window_bounds = array<i64: 1, 128>}, {pipeline_mode = #tpu.pipeline_mode<synchronous>, transform_indices = @transform_1, window_bounds = array<i64: 8, 1>}, {transform_indices = @transform_2, window_bounds = array<i64: 8, 128>}]} {
    %0 = tpu.iota {dimensions = array<i32: 1>} : vector<1x128xi32>
    %c128_i32 = arith.constant 128 : i32
    %1 = arith.muli %arg0, %c128_i32 : i32
    %2 = vector.broadcast %1 : i32 to vector<1x128xi32>
    %3 = arith.addi %0, %2 : vector<1x128xi32>
    %c64_i32 = arith.constant 64 : i32
    %4 = vector.broadcast %c64_i32 : i32 to vector<1x128xi32>
    %5 = arith.cmpi slt, %3, %4 : vector<1x128xi32>
    %c0 = arith.constant 0 : index
    %c0_0 = arith.constant 0 : index
    %6 = vector.load %arg1[%c0, %c0_0] : memref<1x128xf32, #tpu.memory_space<vmem>>, vector<1x128xf32>
    %cst = arith.constant 5.000000e+00 : f32
    %7 = vector.broadcast %cst : f32 to vector<1x128xf32>
    %8 = arith.select %5, %6, %7 : vector<1x128xi1>, vector<1x128xf32>
    %c0_1 = arith.constant 0 : index
    %c0_2 = arith.constant 0 : index
    %9 = vector.load %arg2[%c0_1, %c0_2] : memref<8x1xf32, #tpu.memory_space<vmem>>, vector<8x1xf32>
    %cst_3 = arith.constant 2.000000e-01 : f32
    %10 = vector.broadcast %cst_3 : f32 to vector<1x128xf32>
    %11 = arith.mulf %8, %10 : vector<1x128xf32>
    %cst_4 = arith.constant 1.000000e+00 : f32
    %12 = vector.broadcast %cst_4 : f32 to vector<1x128xf32>
    %13 = arith.divf %12, %11 : vector<1x128xf32>
    %14 = arith.mulf %11, %11 : vector<1x128xf32>
    %15 = arith.mulf %14, %14 : vector<1x128xf32>
    %16 = arith.mulf %11, %15 : vector<1x128xf32>
    %17 = arith.mulf %16, %11 : vector<1x128xf32>
    %18 = arith.mulf %17, %11 : vector<1x128xf32>
    %cst_5 = arith.constant -2.800000e+01 : f32
    %19 = vector.broadcast %cst_5 : f32 to vector<1x128xf32>
    %20 = arith.mulf %19, %16 : vector<1x128xf32>
    %21 = arith.addf %13, %20 : vector<1x128xf32>
    %cst_6 = arith.constant 4.800000e+01 : f32
    %22 = vector.broadcast %cst_6 : f32 to vector<1x128xf32>
    %23 = arith.mulf %22, %17 : vector<1x128xf32>
    %24 = arith.addf %21, %23 : vector<1x128xf32>
    %cst_7 = arith.constant -2.100000e+01 : f32
    %25 = vector.broadcast %cst_7 : f32 to vector<1x128xf32>
    %26 = arith.mulf %25, %18 : vector<1x128xf32>
    %27 = arith.addf %24, %26 : vector<1x128xf32>
    %cst_8 = arith.constant 1.000000e+00 : f32
    %28 = vector.broadcast %cst_8 : f32 to vector<1x128xf32>
    %29 = arith.cmpf olt, %11, %28 : vector<1x128xf32>
    %cst_9 = arith.constant 0.000000e+00 : f32
    %30 = vector.broadcast %cst_9 : f32 to vector<1x128xf32>
    %31 = arith.select %29, %27, %30 : vector<1x128xi1>, vector<1x128xf32>
    %cst_10 = arith.constant 0.632455527 : f32
    %32 = vector.broadcast %cst_10 : f32 to vector<1x128xf32>
    %33 = arith.mulf %31, %32 : vector<1x128xf32>
    %34 = arith.divf %33, %8 : vector<1x128xf32>
    %35 = vector.broadcast %9 : vector<8x1xf32> to vector<8x128xf32>
    %36 = vector.broadcast %11 : vector<1x128xf32> to vector<8x128xf32>
    %37 = arith.mulf %35, %36 : vector<8x128xf32>
    %38 = math.sin %37 : vector<8x128xf32>
    %39 = vector.broadcast %34 : vector<1x128xf32> to vector<8x128xf32>
    %40 = arith.mulf %39, %38 : vector<8x128xf32>
    %c0_11 = arith.constant 0 : index
    %c0_12 = arith.constant 0 : index
    %41 = vector.load %arg3[%c0_11, %c0_12] : memref<8x128xf32, #tpu.memory_space<vmem>>, vector<8x128xf32>
    tpu.vector_store %arg3[%c0_11, %c0_12], %40 {strides = array<i32>} : memref<8x128xf32, #tpu.memory_space<vmem>>, vector<8x128xf32>,
    return
  }
  func.func @transform_0(%arg0: i32) -> (i32, i32) {
    %c0_i32 = arith.constant 0 : i32
    %c0_i32_0 = arith.constant 0 : i32
    return %c0_i32, %arg0 : i32, i32
  }
  func.func @transform_1(%arg0: i32) -> (i32, i32) {
    %c0_i32 = arith.constant 0 : i32
    %c0_i32_0 = arith.constant 0 : i32
    %c0_i32_1 = arith.constant 0 : i32
    return %c0_i32, %c0_i32_0 : i32, i32
  }
  func.func @transform_2(%arg0: i32) -> (i32, i32) {
    %c0_i32 = arith.constant 0 : i32
    %c0_i32_0 = arith.constant 0 : i32
    return %c0_i32, %arg0 : i32, i32
  }
}

</mosaic_0001>

<bundles_post_ra>
// kernel: tpu_custom_call.1
= control target key start
LH: loop header
LB: loop body
LE: loop exit
PB: predicated region body
PF: predicated region fallthrough
CT: control target
= control target key end

     0   :  { %v223_v1 = vmov 0   ;;  %s306_s0 = inlined_call_operand.vmem [shape: f32[1,64], index: 0, kind: input, shape index: {}]   ;;  %s307_s1 = inlined_call_operand.vmem [shape: f32[8,1], index: 1, kind: input, shape index: {}]   ;;  %s308_s2 = inlined_call_operand.hbm [shape: f32[8,64], index: 2, kind: output, shape index: {}]  }
   0x1   :  { %v20_v0 = vld [vmem:[%s307_s1] sm:$0xff]  ;;  %190 = vset.pattern.permute.xlu0 %v223_v1 }
   0x2   :  { %42 = vperm.xlu0 %190, %v20_v0  }
   0x3   :  { %7 = vsyncpa [#allocation3], 0  ;;  %v12_v2 = vlaneseq  ;;  %v18_v4 = vld [vmem:[%s306_s0] sm:$0x1]  ;;  %v224_v22 = vmov 683565275  }
   0x4   :  { %v225_v24 = vmov 2475754826   ;;  %v226_v27 = vmov 2131351028   ;;  %v227_v30 = vmov 2102212464  }
   0x5   :  { %v13_v3 = vand.u32 127, %v12_v2  ;;  %v252_v5 = vshrl.u32 %v12_v2, 7  ;;  %v228_v33 = vmov 920167782   ;;  %v229_v36 = vmov 1326507024  }
   0x6   :  { %s230_s0 = smov [#allocation2]  }
   0x7   :  { %vm17_vm0 = vcmp.lt.s32.totalorder %v13_v3, 64  ;;  %v47_v8 = vsub.s32 0, %v252_v5  ;;  %s166_s1 = sshll.u32 %s230_s0, 4  ;;  %s167_s1 = int_to_ptr.vmem [resolvable:$true] %s166_s1 }
   0x8   :  { %v254_v6 = vsel %vm17_vm0, %v18_v4, 5.0  ;;  %s199_s13 = scalar_lea.vmem %s167_s1, 128  ;;  %p204_p1 = scmp.lt.s32.totalorder %s167_s1, %s167_s1 }
   0x9   :  { %v257_v7 = vmul.f32 0.2, %v254_v6  ;;  %p200_p0 = scmp.ne.s32.totalorder %s167_s1, %s199_s13  ;;  %p205_p2 = scmp.lt.s32.totalorder %s199_s13, %s199_s13 }
   0xb   :  { %v48_v9 = vrot.slane %v257_v7, %v47_v8  ;;  %191 = vrcp.f32 %v257_v7  ;;  %vm35_vm10 = vcmp.lt.f32.partialorder %v257_v7, 1.0  ;;  %p206_p3 = por %p205_p2, %p204_p1 }
   0xc   :  { %193 = vrcp.f32 %v254_v6 }
   0xd   :  { %p207_p4 = pnand %p206_p3, %p200_p0 }
  0x81   :  { %v43_v10 = vpop.permute.xlu0 %42 }
  0x82   :  { %v263_v11 = vmul.f32 %v48_v9, %v43_v10  ;;  %v24_v10 = vmul.f32 %v257_v7, %v257_v7 }
  0x84   :  { %v53_v12 = vand.u32 2139095040, %v263_v11  ;;  %v50_v16 = vand.u32 2147483647, %v263_v11  ;;  %vm52_vm8 = vcmp.lt.s32.totalorder %v263_v11, 0  ;;  %vm142_vm14 = vweird.f32 %v263_v11 }
  0x86   :  { %v54_v13 = vshrl.u32 %v53_v12, 23  ;;  %v57_v19 = vand.u32 8388607, %v50_v16  ;;  %vm51_vm9 = vcmp.le.f32.partialorder %v50_v16, 0.7853982 }
  0x88   :  { %v174_v14 = vadd.s32 4294967169, %v54_v13  ;;  %v58_v38 = vor.u32 8388608, %v57_v19 }
  0x8a   :  { %v60_v15 = vadd.s32 1, %v174_v14  ;;  %v98_v52 = vshll.u32 %v58_v38, 8  ;;  %v25_v14 = vmul.f32 %v24_v10, %v24_v10 }
  0x8c   :  { %vm61_vm1 = vcmp.gt.s32.totalorder %v60_v15, 0 }
  0x8d   :  { %v62_v17 = vsel %vm61_vm1, %v60_v15, 0 }
  0x8e   :  { %v64_v18 = vand.u32 31, %v62_v17  ;;  %v63_v21 = vshrl.u32 %v62_v17, 5 }
  0x90   :  { %v65_v20 = vsub.s32 32, %v64_v18  ;;  %v67_v23 = vshll.u32 %v224_v22, %v64_v18  ;;  %v70_v25 = vshll.u32 %v225_v24, %v64_v18  ;;  %v73_v29 = vshll.u32 %v226_v27, %v64_v18 }
  0x91   :  { %v76_v32 = vshll.u32 %v227_v30, %v64_v18  ;;  %v79_v35 = vshll.u32 %v228_v33, %v64_v18  ;;  %vm82_vm2 = vcmp.lt.s32.totalorder %v63_v21, 1  ;;  %vm85_vm3 = vcmp.lt.s32.totalorder %v63_v21, 4 }
  0x92   :  { %v68_v26 = vshrl.u32 %v225_v24, %v65_v20  ;;  %v71_v28 = vshrl.u32 %v226_v27, %v65_v20  ;;  %v74_v31 = vshrl.u32 %v227_v30, %v65_v20  ;;  %v77_v34 = vshrl.u32 %v228_v33, %v65_v20 }
  0x93   :  { %v80_v37 = vshrl.u32 %v229_v36, %v65_v20  ;;  %v66_v47 = vshrl.u32 %v224_v22, %v65_v20  ;;  %vm84_vm4 = vcmp.lt.s32.totalorder %v63_v21, 3  ;;  %vm83_vm5 = vcmp.lt.s32.totalorder %v63_v21, 2 }
  0x94   :  { %v69_v39 = vor.u32 %v68_v26, %v67_v23  ;;  %v72_v40 = vor.u32 %v71_v28, %v70_v25  ;;  %v75_v41 = vor.u32 %v74_v31, %v73_v29  ;;  %v78_v42 = vor.u32 %v77_v34, %v76_v32  ;;  %v192_v28 = vpop.eup %191 }
  0x95   :  { %v81_v43 = vor.u32 %v80_v37, %v79_v35  ;;  %v26_v18 = vmul.f32 %v25_v14, %v257_v7  ;;  %v194_v6 = vpop.eup %193 }
  0x96   :  { %v87_v44 = vsel %vm85_vm3, %v75_v41, 2102212464  ;;  %v90_v45 = vsel %vm82_vm2, %v69_v39, %v72_v40  ;;  %v94_v46 = vsel %vm82_vm2, %v72_v40, %v75_v41  ;;  %v91_v48 = vsel %vm85_vm3, %v78_v42, 920167782 }
  0x97   :  { %v95_v49 = vsel %vm85_vm3, %v81_v43, 1326507024  ;;  %v92_v50 = vsel %vm84_vm4, %v75_v41, %v91_v48  ;;  %v86_v53 = vsel %vm82_vm2, %v66_v47, %v69_v39  ;;  %v88_v54 = vsel %vm84_vm4, %v72_v40, %v87_v44 }
  0x98   :  { %v96_v51 = vsel %vm84_vm4, %v78_v42, %v95_v49  ;;  %v93_v55 = vsel %vm83_vm5, %v90_v45, %v92_v50  ;;  %v89_v61 = vsel %vm83_vm5, %v86_v53, %v88_v54  ;;  %v27_v23 = vmul.f32 %v26_v18, %v257_v7 }
  0x99   :  { %v97_v56 = vsel %vm83_vm5, %v94_v46, %v96_v51  ;;  %v272_v59 = vmul.u32.u64.low %v98_v52, %v93_v55  ;;  %v273_v60 = vmul.u32.u64.high %v98_v52, %v93_v55, %v272_v59  ;;  %v105_v63 = vmul.u32 %v98_v52, %v89_v61 }
  0x9a   :  { %v269_v57 = vmul.u32.u64.low %v98_v52, %v97_v56  ;;  %v270_v58 = vmul.u32.u64.high %v98_v52, %v97_v56, %v269_v57  ;;  %v29_v27 = vmul.f32 -28.0, %v26_v18  ;;  %v28_v32 = vmul.f32 %v27_v23, %v257_v7 }
  0x9b   :  { %v108_v62 = vadd.s32 1, %v273_v60  ;;  %v31_v34 = vmul.f32 48.0, %v27_v23 }
  0x9c   :  { %vm107_vm6 = vc.u32 %v270_v58, %v272_v59  ;;  %v106_v20 = vadd.s32 %v272_v59, %v270_v58  ;;  %v30_v33 = vadd.f32 %v192_v28, %v29_v27  ;;  %v33_v39 = vmul.f32 -21.0, %v28_v32 }
  0x9d   :  { %v109_v0 = vsel %vm107_vm6, %v108_v62, %v273_v60 }
  0x9e   :  { %v110_v1 = vadd.s32 %v109_v0, %v105_v63  ;;  %v32_v38 = vadd.f32 %v31_v34, %v30_v33 }
  0xa0   :  { %v111_v2 = vadd.s32 536870912, %v110_v1  ;;  %v34_v43 = vadd.f32 %v33_v39, %v32_v38 }
  0xa2   :  { %v112_v3 = vshrl.u32 %v111_v2, 30  ;;  %v36_v47 = vsel %vm35_vm10, %v34_v43, 0.0 }
  0xa3   :  { %v37_v49 = vmul.f32 0.6324555, %v36_v47 }
  0xa4   :  { %v113_v4 = vshll.u32 %v112_v3, 30  ;;  %v136_v40 = vsub.s32 4, %v112_v3 }
  0xa5   :  { %v39_v51 = vmul.f32 %v194_v6, %v37_v49 }
  0xa6   :  { %v114_v9 = vsub.s32 %v110_v1, %v113_v4  ;;  %v137_v44 = vsel %vm52_vm8, %v136_v40, %v112_v3 }
  0xa7   :  { %v139_v46 = vsel %vm51_vm9, 0, %v137_v44  ;;  %v157_v7 = vrot.slane %v39_v51, %v47_v8 }
  0xa8   :  { %v116_v12 = vsub.s32 0, %v114_v9  ;;  %v143_v48 = vadd.s32 3, %v139_v46 }
  0xaa   :  { %v175_v13 = vmin.u32 %v116_v12, %v114_v9  ;;  %v144_v50 = vand.u32 3, %v143_v48 }
  0xac   :  { %v118_v15 = vclz %v175_v13  ;;  %vm149_vm11 = vcmp.eq.s32.totalorder %v144_v50, 2  ;;  %vm146_vm12 = vcmp.eq.s32.totalorder %v144_v50, 0  ;;  %vm145_vm13 = vcmp.lt.s32.totalorder %v144_v50, 2 }
  0xae   :  { %v176_v17 = vadd.s32 4294967294, %v118_v15 }
  0xb0   :  { %vm177_vm7 = vcmp.lt.s32.totalorder %v176_v17, 0 }
  0xb1   :  { %v121_v19 = vsel %vm177_vm7, 0, %v176_v17 }
  0xb2   :  { %v122_v21 = vsub.s32 32, %v121_v19  ;;  %v126_v22 = vsub.s32 4294967266, %v121_v19  ;;  %v123_v24 = vshll.u32 %v114_v9, %v121_v19 }
  0xb4   :  { %v124_v25 = vshrl.u32 %v106_v20, %v122_v21  ;;  %v127_v26 = vadd.s32 127, %v126_v22 }
  0xb6   :  { %v125_v29 = vor.u32 %v124_v25, %v123_v24  ;;  %v128_v30 = vshll.u32 %v127_v26, 23 }
  0xb8   :  { %v129_v31 = vor.u32 4788187, %v128_v30  ;;  %v132_v36 = vcvt.s32.f32 %v125_v29 }
  0xba   :  { %v130_v35 = vand.u32 2147483647, %v129_v31 }
  0xbc   :  { %v133_v37 = vmul.f32 %v132_v36, %v130_v35 }
  0xbe   :  { %v134_v41 = vxor.u32 2147483648, %v133_v37 }
  0xc0   :  { %v135_v42 = vsel %vm52_vm8, %v134_v41, %v133_v37 }
  0xc1   :  { %v138_v45 = vsel %vm51_vm9, %v263_v11, %v135_v42 }
  0xc2   :  { %195 = vcosq.f32 %v138_v45 }
  0xc3   :  { %197 = vsinq.f32 %v138_v45 }
  0xcc   :  { %v196_v52 = vpop.eup %195 }
  0xcd   :  { %v198_v53 = vpop.eup %197  ;;  %v150_v54 = vxor.u32 2147483648, %v196_v52 }
  0xce   :  { %v147_v55 = vxor.u32 2147483648, %v198_v53 }
  0xcf   :  { %v151_v16 = vsel %vm149_vm11, %v150_v54, %v198_v53 }
  0xd0   :  { %v148_v56 = vsel %vm146_vm12, %v196_v52, %v147_v55 }
  0xd1   :  { %v152_v57 = vsel %vm145_vm13, %v148_v56, %v151_v16 }
  0xd2   :  { %v153_v58 = vsel %vm142_vm14, nan, %v152_v57 }
  0xd3   :  { %v158_v59 = vmul.f32 %v157_v7, %v153_v58 }
  0xd5   :  { %159 = vst [vmem:[#allocation2] sm:$0xff] %v158_v59 }
  0xd6   :  { %210 = shalt.err (!%p207_p4)
}
  0xd7   :  { %s211_s16 = scalar_lea.hbm %s308_s2, 128 }
  0xd8   :  { %p212_p5 = scmp.ne.s32.totalorder %s308_s2, %s211_s16  ;;  %p215_p6 = scmp.lt.u32.totalorder %s211_s16, %s308_s2 }
  0xda   :  { %p217_p7 = pnand %p215_p6, %p212_p5 }
  0xdc   :  { %220 = shalt.err (!%p217_p7)
}
  0xdd   :  { %169 = dma.vmem_to_hbm [thread:$0]  %s167_s1, 128, %s308_s2, [#allocation3]  }
  0xde   :  { %221 = dma.done.wait [#allocation3], 128  }
  0xdf   :  { %222 = vsyncadd [#allocation3], 4294967168 }
  0xe0   :  { %173 = vsyncpa [#allocation3], 1 }

</bundles_post_ra>
